<compile_context>
chip_gen: v7x
topology: tpu7x:2x2x1
jax: 0.10.0
libtpu: 0.0.40
codegen_flags: <defaults>
</compile_context>

<pallas_src>
import math

import jax
import jax.numpy as jnp
from jax.experimental import pallas as pl
from jax.experimental.pallas import tpu as pltpu

_HALF_LOG_2PI = 0.5 * math.log(2.0 * math.pi)


def _round_up(x, m):
    return ((x + m - 1) // m) * m


def _mlp_mu(obs_ref, w1_ref, b1_ref, w2_ref, b2_ref, wm_ref, bm_ref):
    """Linear->Tanh->Linear->Tanh then tanh(mu_head); bf16 MXU, f32 accum."""
    bf16 = jnp.bfloat16
    x = obs_ref[...].astype(bf16)
    h1 = jnp.tanh(
        jnp.dot(x, w1_ref[...], preferred_element_type=jnp.float32) + b1_ref[...])
    h2 = jnp.tanh(
        jnp.dot(h1.astype(bf16), w2_ref[...], preferred_element_type=jnp.float32)
        + b2_ref[...])
    mu = jnp.tanh(
        jnp.dot(h2.astype(bf16), wm_ref[...], preferred_element_type=jnp.float32)
        + bm_ref[...])
    return mu


def _ppo_actor_sample_kernel(obs_ref, eps_ref, w1_ref, b1_ref, w2_ref, b2_ref,
                             wm_ref, bm_ref, std_ref, inv_std_ref, lpc_ref,
                             out_ref):
    """Stochastic path: action = clip(mu + std*eps), logp of the clipped action."""
    act_dim = eps_ref.shape[-1]
    mu = _mlp_mu(obs_ref, w1_ref, b1_ref, w2_ref, b2_ref, wm_ref, bm_ref)

    action = jnp.clip(mu + std_ref[...] * eps_ref[...], -1.0, 1.0)

    # Normal(mu, std).log_prob(action).sum(-1); lpc = -log_std - 0.5*log(2*pi).
    z = (action - mu) * inv_std_ref[...]
    logp = lpc_ref[...] - 0.5 * z * z

    out_ref[:, :act_dim] = action
    out_ref[:, act_dim:] = jnp.sum(logp, axis=-1, keepdims=True)


def _ppo_actor_det_kernel(obs_ref, w1_ref, b1_ref, w2_ref, b2_ref,
                          wm_ref, bm_ref, lpc_ref, out_ref):
    """Deterministic path: action = mu, log_prob is a per-row constant."""
    act_dim = out_ref.shape[-1] - 1
    mu = _mlp_mu(obs_ref, w1_ref, b1_ref, w2_ref, b2_ref, wm_ref, bm_ref)

    out_ref[:, :act_dim] = mu
    row_logp = jnp.sum(lpc_ref[...], axis=-1, keepdims=True)          # (1, 1)
    out_ref[:, act_dim:] = jnp.broadcast_to(row_logp, (out_ref.shape[0], 1))


def ppo_actor_forward(obs, params, seed=0, deterministic=False, tile_m=2048):
    """Pallas-backed PPOActor.forward -> (action [B, act_dim], log_prob [B])."""
    obs = obs.astype(jnp.float32)
    B, obs_dim = obs.shape
    h1d = params["w1"].shape[1]
    h2d = params["w2"].shape[1]
    act_dim = params["wm"].shape[1]

    # Large tiles amortize the ~0.35us per-grid-step overhead; keep >= 2 grid
    # steps when B allows so v7x's two TensorCores both get work.
    if B >= 16:
        tm = min(tile_m, _round_up(pl.cdiv(B, 2), 8))
    else:
        tm = B
    grid = (pl.cdiv(B, tm),)

    def batch_map(i):
        return (i, 0)

    def const_map(i):
        return (0, 0)

    # bf16 MXU operands with f32 accumulation; everything else stays f32.
    w1 = params["w1"].astype(jnp.bfloat16)
    w2 = params["w2"].astype(jnp.bfloat16)
    wm = params["wm"].astype(jnp.bfloat16)
    b1 = params["b1"].astype(jnp.float32)
    b2 = params["b2"].astype(jnp.float32)
    bm = params["bm"].astype(jnp.float32)
    log_std = params["log_std"].astype(jnp.float32)                   # (1, A)
    std = jnp.exp(log_std)
    inv_std = jnp.exp(-log_std)
    logp_const = -log_std - _HALF_LOG_2PI

    weight_specs = [
        pl.BlockSpec((obs_dim, h1d), const_map),
        pl.BlockSpec((1, h1d), const_map),
        pl.BlockSpec((h1d, h2d), const_map),
        pl.BlockSpec((1, h2d), const_map),
        pl.BlockSpec((h2d, act_dim), const_map),
        pl.BlockSpec((1, act_dim), const_map),
    ]
    row_spec = pl.BlockSpec((1, act_dim), const_map)
    obs_spec = pl.BlockSpec((tm, obs_dim), batch_map)
    eps_spec = pl.BlockSpec((tm, act_dim), batch_map)

    # Merged output block: action columns + one logp column.
    out_spec = pl.BlockSpec((tm, act_dim + 1), batch_map)
    out_shape = jax.ShapeDtypeStruct((B, act_dim + 1), jnp.float32)

    # Scheduler hints.
    flops = 2 * B * (obs_dim * h1d + h1d * h2d + h2d * act_dim)
    transcendentals = B * (h1d + h2d + act_dim)
    weight_bytes = (2 * (obs_dim * h1d + h1d * h2d + h2d * act_dim)
                    + 4 * (h1d + h2d + 4 * act_dim))
    noise_cols = 0 if deterministic else act_dim
    io_bytes = 4 * B * (obs_dim + noise_cols + act_dim + 1)
    cost = pl.CostEstimate(flops=flops, transcendentals=transcendentals,
                           bytes_accessed=io_bytes + weight_bytes)

    # VMEM budget: double-buffered io tiles + resident weights + f32 hidden
    # activations / pre-tanh temps / bf16 copies for the (tm, h) intermediates.
    io_tile_bytes = 4 * tm * (obs_dim + noise_cols + act_dim + 1)
    act_bytes = 3 * 4 * tm * (h1d + h2d)
    vmem_limit = int(min(max(4 * io_tile_bytes + 2 * weight_bytes + act_bytes
                             + (4 << 20), 16 << 20), 48 << 20))
    cparams = pltpu.CompilerParams(
        dimension_semantics=("parallel",),
        vmem_limit_bytes=vmem_limit,
    )

    if deterministic:
        out = pl.pallas_call(
            _ppo_actor_det_kernel,
            out_shape=out_shape,
            grid=grid,
            in_specs=[obs_spec] + weight_specs + [row_spec],
            out_specs=out_spec,
            compiler_params=cparams,
            cost_estimate=cost,
        )(obs, w1, b1, w2, b2, wm, bm, logp_const)
    else:
        eps = jax.random.normal(jax.random.PRNGKey(seed), (B, act_dim),
                                jnp.float32)
        out = pl.pallas_call(
            _ppo_actor_sample_kernel,
            out_shape=out_shape,
            grid=grid,
            in_specs=[obs_spec, eps_spec] + weight_specs
                     + [row_spec, row_spec, row_spec],
            out_specs=out_spec,
            compiler_params=cparams,
            cost_estimate=cost,
        )(obs, eps, w1, b1, w2, b2, wm, bm, std, inv_std, logp_const)

    action = out[:, :act_dim]
    log_prob = out[:, act_dim]
    return action, log_prob


def init_params(key, obs_dim, act_dim, hidden_sizes=(256, 256)):
    """PyTorch-Linear-style init (U[-1/sqrt(fan_in), 1/sqrt(fan_in)])."""
    h1, h2 = hidden_sizes
    keys = jax.random.split(key, 6)

    def lin(kw, kb, fan_in, fan_out):
        bound = 1.0 / math.sqrt(fan_in)
        w = jax.random.uniform(kw, (fan_in, fan_out), jnp.float32, -bound, bound)
        b = jax.random.uniform(kb, (1, fan_out), jnp.float32, -bound, bound)
        return w, b

    w1, b1 = lin(keys[0], keys[1], obs_dim, h1)
    w2, b2 = lin(keys[2], keys[3], h1, h2)
    wm, bm = lin(keys[4], keys[5], h2, act_dim)
    return {
        "w1": w1, "b1": b1,
        "w2": w2, "b2": b2,
        "wm": wm, "bm": bm,
        "log_std": jnp.zeros((1, act_dim), jnp.float32),  # nn.Parameter(zeros)
    }


def _mu_reference(obs, p):
    """Reference with the same numerics as the kernel (bf16 MXU, f32 acc)."""
    bf16 = jnp.bfloat16
    h1 = jnp.tanh(jnp.dot(obs.astype(bf16), p["w1"].astype(bf16),
                          preferred_element_type=jnp.float32) + p["b1"])
    h2 = jnp.tanh(jnp.dot(h1.astype(bf16), p["w2"].astype(bf16),
                          preferred_element_type=jnp.float32) + p["b2"])
    return jnp.tanh(jnp.dot(h2.astype(bf16), p["wm"].astype(bf16),
                            preferred_element_type=jnp.float32) + p["bm"])


if __name__ == "__main__":
    B, OBS_DIM, ACT_DIM = 64, 16, 8
    HIDDEN = (256, 256)   # module default hidden_sizes=[256, 256]

    key = jax.random.PRNGKey(0)
    k_param, k_obs = jax.random.split(key, 2)

    params = init_params(k_param, OBS_DIM, ACT_DIM, HIDDEN)
    obs = jax.random.normal(k_obs, (B, OBS_DIM), jnp.float32)

    # Stochastic path.
    action, log_prob = ppo_actor_forward(obs, params, seed=42, deterministic=False)
    jax.block_until_ready((action, log_prob))
    assert action.shape == (B, ACT_DIM) and log_prob.shape == (B,)
    assert bool(jnp.all(jnp.abs(action) <= 1.0 + 1e-6)), "action not clipped to [-1,1]"

    # Consistency: log_prob == Normal(mu, std).log_prob(action).sum(-1).
    mu_ref = _mu_reference(obs, params)
    std_ref = jnp.exp(params["log_std"])
    z = (action - mu_ref) / std_ref
    logp_ref = jnp.sum(-0.5 * z * z - params["log_std"] - _HALF_LOG_2PI, axis=-1)
    assert bool(jnp.allclose(log_prob, logp_ref, atol=2e-2, rtol=2e-2)), "log_prob mismatch"

    # Deterministic path (separate kernel, no noise stream at all).
    action_d, log_prob_d = ppo_actor_forward(obs, params, deterministic=True)
    jax.block_until_ready((action_d, log_prob_d))
    logp_det_ref = jnp.broadcast_to(
        jnp.sum(-params["log_std"] - _HALF_LOG_2PI, axis=-1), (B,))
    assert bool(jnp.allclose(action_d, mu_ref, atol=2e-2, rtol=2e-2)), "mu mismatch"
    assert bool(jnp.allclose(log_prob_d, logp_det_ref, atol=1e-4)), "det log_prob mismatch"

    print("KERNEL_OK")
</pallas_src>

<mosaic_0001>
module attributes {stable_mosaic.version = 11 : i64} {
  func.func @_ppo_actor_sample_kernel(%arg0: i32, %arg1: memref<32x16xf32, #tpu.memory_space<vmem>>, %arg2: memref<32x8xf32, #tpu.memory_space<vmem>>, %arg3: memref<16x256xbf16, #tpu.memory_space<vmem>>, %arg4: memref<1x256xf32, #tpu.memory_space<vmem>>, %arg5: memref<256x256xbf16, #tpu.memory_space<vmem>>, %arg6: memref<1x256xf32, #tpu.memory_space<vmem>>, %arg7: memref<256x8xbf16, #tpu.memory_space<vmem>>, %arg8: memref<1x8xf32, #tpu.memory_space<vmem>>, %arg9: memref<1x8xf32, #tpu.memory_space<vmem>>, %arg10: memref<1x8xf32, #tpu.memory_space<vmem>>, %arg11: memref<1x8xf32, #tpu.memory_space<vmem>>, %arg12: memref<32x9xf32, #tpu.memory_space<vmem>>) attributes {dimension_semantics = [#tpu.dimension_semantics<parallel>], iteration_bounds = array<i64: 2>, scalar_prefetch = 0 : i64, scratch_operands = 0 : i64, tpu.core_type = #tpu.core_type<tc>, window_params = [{transform_indices = @transform_0, window_bounds = array<i64: 32, 16>}, {transform_indices = @transform_1, window_bounds = array<i64: 32, 8>}, {pipeline_mode = #tpu.pipeline_mode<synchronous>, transform_indices = @transform_2, window_bounds = array<i64: 16, 256>}, {pipeline_mode = #tpu.pipeline_mode<synchronous>, transform_indices = @transform_3, window_bounds = array<i64: 1, 256>}, {pipeline_mode = #tpu.pipeline_mode<synchronous>, transform_indices = @transform_4, window_bounds = array<i64: 256, 256>}, {pipeline_mode = #tpu.pipeline_mode<synchronous>, transform_indices = @transform_5, window_bounds = array<i64: 1, 256>}, {pipeline_mode = #tpu.pipeline_mode<synchronous>, transform_indices = @transform_6, window_bounds = array<i64: 256, 8>}, {pipeline_mode = #tpu.pipeline_mode<synchronous>, transform_indices = @transform_7, window_bounds = array<i64: 1, 8>}, {pipeline_mode = #tpu.pipeline_mode<synchronous>, transform_indices = @transform_8, window_bounds = array<i64: 1, 8>}, {pipeline_mode = #tpu.pipeline_mode<synchronous>, transform_indices = @transform_9, window_bounds = array<i64: 1, 8>}, {pipeline_mode = #tpu.pipeline_mode<synchronous>, transform_indices = @transform_10, window_bounds = array<i64: 1, 8>}, {transform_indices = @transform_11, window_bounds = array<i64: 32, 9>}]} {
    %c0 = arith.constant 0 : index
    %c0_0 = arith.constant 0 : index
    %0 = vector.load %arg1[%c0, %c0_0] : memref<32x16xf32, #tpu.memory_space<vmem>>, vector<32x16xf32>
    %1 = arith.truncf %0 : vector<32x16xf32> to vector<32x16xbf16>
    %c0_1 = arith.constant 0 : index
    %c0_2 = arith.constant 0 : index
    %2 = vector.load %arg3[%c0_1, %c0_2] : memref<16x256xbf16, #tpu.memory_space<vmem>>, vector<16x256xbf16>
    %cst = arith.constant dense<0.000000e+00> : vector<32x256xf32>
    %3 = tpu.matmul %1, %2, %cst {dimension_numbers = #tpu.dot_dimension_numbers<[1], [0], [0], [1], [0, 0, 1, 1], [], []>} : vector<32x16xbf16>, vector<16x256xbf16>, vector<32x256xf32> -> vector<32x256xf32>
    %c0_3 = arith.constant 0 : index
    %c0_4 = arith.constant 0 : index
    %4 = vector.load %arg4[%c0_3, %c0_4] : memref<1x256xf32, #tpu.memory_space<vmem>>, vector<1x256xf32>
    %5 = vector.broadcast %4 : vector<1x256xf32> to vector<32x256xf32>
    %6 = arith.addf %3, %5 : vector<32x256xf32>
    %7 = math.tanh %6 : vector<32x256xf32>
    %8 = arith.truncf %7 : vector<32x256xf32> to vector<32x256xbf16>
    %c0_5 = arith.constant 0 : index
    %c0_6 = arith.constant 0 : index
    %9 = vector.load %arg5[%c0_5, %c0_6] : memref<256x256xbf16, #tpu.memory_space<vmem>>, vector<256x256xbf16>
    %cst_7 = arith.constant dense<0.000000e+00> : vector<32x256xf32>
    %10 = tpu.matmul %8, %9, %cst_7 {dimension_numbers = #tpu.dot_dimension_numbers<[1], [0], [0], [1], [0, 0, 1, 1], [], []>} : vector<32x256xbf16>, vector<256x256xbf16>, vector<32x256xf32> -> vector<32x256xf32>
    %c0_8 = arith.constant 0 : index
    %c0_9 = arith.constant 0 : index
    %11 = vector.load %arg6[%c0_8, %c0_9] : memref<1x256xf32, #tpu.memory_space<vmem>>, vector<1x256xf32>
    %12 = vector.broadcast %11 : vector<1x256xf32> to vector<32x256xf32>
    %13 = arith.addf %10, %12 : vector<32x256xf32>
    %14 = math.tanh %13 : vector<32x256xf32>
    %15 = arith.truncf %14 : vector<32x256xf32> to vector<32x256xbf16>
    %c0_10 = arith.constant 0 : index
    %c0_11 = arith.constant 0 : index
    %16 = vector.load %arg7[%c0_10, %c0_11] : memref<256x8xbf16, #tpu.memory_space<vmem>>, vector<256x8xbf16>
    %cst_12 = arith.constant dense<0.000000e+00> : vector<32x8xf32>
    %17 = tpu.matmul %15, %16, %cst_12 {dimension_numbers = #tpu.dot_dimension_numbers<[1], [0], [0], [1], [0, 0, 1, 1], [], []>} : vector<32x256xbf16>, vector<256x8xbf16>, vector<32x8xf32> -> vector<32x8xf32>
    %c0_13 = arith.constant 0 : index
    %c0_14 = arith.constant 0 : index
    %18 = vector.load %arg8[%c0_13, %c0_14] : memref<1x8xf32, #tpu.memory_space<vmem>>, vector<1x8xf32>
    %19 = vector.broadcast %18 : vector<1x8xf32> to vector<32x8xf32>
    %20 = arith.addf %17, %19 : vector<32x8xf32>
    %21 = math.tanh %20 : vector<32x8xf32>
    %c0_15 = arith.constant 0 : index
    %c0_16 = arith.constant 0 : index
    %22 = vector.load %arg9[%c0_15, %c0_16] : memref<1x8xf32, #tpu.memory_space<vmem>>, vector<1x8xf32>
    %c0_17 = arith.constant 0 : index
    %c0_18 = arith.constant 0 : index
    %23 = vector.load %arg2[%c0_17, %c0_18] : memref<32x8xf32, #tpu.memory_space<vmem>>, vector<32x8xf32>
    %24 = vector.broadcast %22 : vector<1x8xf32> to vector<32x8xf32>
    %25 = arith.mulf %24, %23 : vector<32x8xf32>
    %26 = arith.addf %21, %25 : vector<32x8xf32>
    %cst_19 = arith.constant -1.000000e+00 : f32
    %cst_20 = arith.constant 1.000000e+00 : f32
    %27 = vector.broadcast %cst_19 : f32 to vector<32x8xf32>
    %28 = arith.maximumf %27, %26 : vector<32x8xf32>
    %29 = vector.broadcast %cst_20 : f32 to vector<32x8xf32>
    %30 = arith.minimumf %29, %28 : vector<32x8xf32>
    %31 = arith.subf %30, %21 : vector<32x8xf32>
    %c0_21 = arith.constant 0 : index
    %c0_22 = arith.constant 0 : index
    %32 = vector.load %arg10[%c0_21, %c0_22] : memref<1x8xf32, #tpu.memory_space<vmem>>, vector<1x8xf32>
    %33 = vector.broadcast %32 : vector<1x8xf32> to vector<32x8xf32>
    %34 = arith.mulf %31, %33 : vector<32x8xf32>
    %c0_23 = arith.constant 0 : index
    %c0_24 = arith.constant 0 : index
    %35 = vector.load %arg11[%c0_23, %c0_24] : memref<1x8xf32, #tpu.memory_space<vmem>>, vector<1x8xf32>
    %cst_25 = arith.constant 5.000000e-01 : f32
    %36 = vector.broadcast %cst_25 : f32 to vector<32x8xf32>
    %37 = arith.mulf %36, %34 : vector<32x8xf32>
    %38 = arith.mulf %37, %34 : vector<32x8xf32>
    %39 = vector.broadcast %35 : vector<1x8xf32> to vector<32x8xf32>
    %40 = arith.subf %39, %38 : vector<32x8xf32>
    %c0_26 = arith.constant 0 : index
    %c0_27 = arith.constant 0 : index
    %41 = vector.load %arg12[%c0_26, %c0_27] : memref<32x9xf32, #tpu.memory_space<vmem>>, vector<32x8xf32>
    tpu.vector_store %arg12[%c0_26, %c0_27], %30 {strides = array<i32>} : memref<32x9xf32, #tpu.memory_space<vmem>>, vector<32x8xf32>,
    %cst_28 = arith.constant dense<0.000000e+00> : vector<32xf32>
    %42 = vector.multi_reduction <add>, %40, %cst_28 [1] : vector<32x8xf32> to vector<32xf32>
    %43 = vector.shape_cast %42 : vector<32xf32> to vector<32x1xf32>
    %c0_29 = arith.constant 0 : index
    %c8 = arith.constant 8 : index
    %44 = vector.load %arg12[%c0_29, %c8] : memref<32x9xf32, #tpu.memory_space<vmem>>, vector<32x1xf32>
    tpu.vector_store %arg12[%c0_29, %c8], %43 {strides = array<i32>} : memref<32x9xf32, #tpu.memory_space<vmem>>, vector<32x1xf32>,
    return
  }
  func.func @transform_0(%arg0: i32) -> (i32, i32) {
    %c0_i32 = arith.constant 0 : i32
    %c0_i32_0 = arith.constant 0 : i32
    return %arg0, %c0_i32 : i32, i32
  }
  func.func @transform_1(%arg0: i32) -> (i32, i32) {
    %c0_i32 = arith.constant 0 : i32
    %c0_i32_0 = arith.constant 0 : i32
    return %arg0, %c0_i32 : i32, i32
  }
  func.func @transform_2(%arg0: i32) -> (i32, i32) {
    %c0_i32 = arith.constant 0 : i32
    %c0_i32_0 = arith.constant 0 : i32
    %c0_i32_1 = arith.constant 0 : i32
    return %c0_i32, %c0_i32_0 : i32, i32
  }
  func.func @transform_3(%arg0: i32) -> (i32, i32) {
    %c0_i32 = arith.constant 0 : i32
    %c0_i32_0 = arith.constant 0 : i32
    %c0_i32_1 = arith.constant 0 : i32
    return %c0_i32, %c0_i32_0 : i32, i32
  }
  func.func @transform_4(%arg0: i32) -> (i32, i32) {
    %c0_i32 = arith.constant 0 : i32
    %c0_i32_0 = arith.constant 0 : i32
    %c0_i32_1 = arith.constant 0 : i32
    return %c0_i32, %c0_i32_0 : i32, i32
  }
  func.func @transform_5(%arg0: i32) -> (i32, i32) {
    %c0_i32 = arith.constant 0 : i32
    %c0_i32_0 = arith.constant 0 : i32
    %c0_i32_1 = arith.constant 0 : i32
    return %c0_i32, %c0_i32_0 : i32, i32
  }
  func.func @transform_6(%arg0: i32) -> (i32, i32) {
    %c0_i32 = arith.constant 0 : i32
    %c0_i32_0 = arith.constant 0 : i32
    %c0_i32_1 = arith.constant 0 : i32
    return %c0_i32, %c0_i32_0 : i32, i32
  }
  func.func @transform_7(%arg0: i32) -> (i32, i32) {
    %c0_i32 = arith.constant 0 : i32
    %c0_i32_0 = arith.constant 0 : i32
    %c0_i32_1 = arith.constant 0 : i32
    return %c0_i32, %c0_i32_0 : i32, i32
  }
  func.func @transform_8(%arg0: i32) -> (i32, i32) {
    %c0_i32 = arith.constant 0 : i32
    %c0_i32_0 = arith.constant 0 : i32
    %c0_i32_1 = arith.constant 0 : i32
    return %c0_i32, %c0_i32_0 : i32, i32
  }
  func.func @transform_9(%arg0: i32) -> (i32, i32) {
    %c0_i32 = arith.constant 0 : i32
    %c0_i32_0 = arith.constant 0 : i32
    %c0_i32_1 = arith.constant 0 : i32
    return %c0_i32, %c0_i32_0 : i32, i32
  }
  func.func @transform_10(%arg0: i32) -> (i32, i32) {
    %c0_i32 = arith.constant 0 : i32
    %c0_i32_0 = arith.constant 0 : i32
    %c0_i32_1 = arith.constant 0 : i32
    return %c0_i32, %c0_i32_0 : i32, i32
  }
  func.func @transform_11(%arg0: i32) -> (i32, i32) {
    %c0_i32 = arith.constant 0 : i32
    %c0_i32_0 = arith.constant 0 : i32
    return %arg0, %c0_i32 : i32, i32
  }
}

</mosaic_0001>

<bundles_post_ra>
// kernel: tpu_custom_call.1
= control target key start
LH: loop header
LB: loop body
LE: loop exit
PB: predicated region body
PF: predicated region fallthrough
CT: control target
= control target key end

     0   :  { %s1409_s17 = smov 0   ;;  %s1634_s0 = inlined_call_operand.vmem [shape: f32[64,16], index: 0, kind: input, shape index: {}]   ;;  %s1635_s1 = inlined_call_operand.vmem [shape: f32[64,8], index: 1, kind: input, shape index: {}]   ;;  %s1636_s2 = inlined_call_operand.vmem [shape: bf16[16,256], index: 2, kind: input, shape index: {}]   ;;  %s1637_s3 = inlined_call_operand.vmem [shape: f32[1,256], index: 3, kind: input, shape index: {}]   ;;  %s1638_s4 = inlined_call_operand.vmem [shape: bf16[256,256], index: 4, kind: input, shape index: {}]   ;;  %s1639_s5 = inlined_call_operand.vmem [shape: f32[1,256], index: 5, kind: input, shape index: {}]   ;;  %s1640_s6 = inlined_call_operand.vmem [shape: bf16[256,8], index: 6, kind: input, shape index: {}]   ;;  %s1641_s7 = inlined_call_operand.vmem [shape: f32[1,8], index: 7, kind: input, shape index: {}]   ;;  %s1642_s8 = inlined_call_operand.vmem [shape: f32[1,8], index: 8, kind: input, shape index: {}]   ;;  %s1643_s9 = inlined_call_operand.vmem [shape: f32[1,8], index: 9, kind: input, shape index: {}]   ;;  %s1644_s10 = inlined_call_operand.vmem [shape: f32[1,8], index: 10, kind: input, shape index: {}]   ;;  %s1645_s11 = inlined_call_operand.vmem [shape: f32[64,9], index: 11, kind: output, shape index: {}]  }
   0x1 LB: > { %s1123_s18 = sadd.s32 4294967295, %s1346_s17   ;;  %p1127_p0 = scmp.ge.s32.totalorder %s1346_s17, 1  ;;  %s1346_s17 = sphi %s1409_s17, %s21_s17  }
   0x2   : > { %p349_p1 = scmp.lt.s32.totalorder %s1346_s17, 3 }
   0x4   : > { %p350_p2 = pnand %p1127_p0, %p349_p1 }
   0x5   : > { %v1233_v0 = vld [vmem:[%s1636_s2 + $0x4] ss:$8 sps:$4 sm:$0xff] (!%p350_p2)   ;;  %s1128_s21 = sshll.u32 (!%p350_p2), %s1123_s18, 2  ;;  %v1235_v1 = vld [vmem:[%s1636_s2] ss:$8 sps:$4 sm:$0xff] (!%p350_p2)   ;;  %v1348_v2 = vmov (!%p350_p2), 0   ;;  %v423_v47 = vlaneseq (!%p350_p2) }
   0x6   : > { %353 = sbr.rel (%p350_p2) target bundleno = 879 (0x36f), region = 64  ;;  %482 = vmatprep.mubr.bf16.mxu0 (!%p350_p2), %v1348_v2  ;;  %p395_p3 = scmp.lt.s32.totalorder (!%p350_p2), %s1128_s21, 7  ;;  %450 = vmatprep.subr.bf16.mxu0 (!%p350_p2), %v1233_v0  ;;  %v1236_v3 = vld [vmem:[%s1638_s4 + $0x4] ss:$8 sps:$4 sm:$0xff] (!%p350_p2)   ;;  %v1238_v4 = vld [vmem:[%s1638_s4] ss:$8 sps:$4 sm:$0xff] (!%p350_p2)  }
   0x7   : > { %451 = vmatpush1.bf16.msra.mxu0 (!%p350_p2), %v1235_v1  ;;  %v1239_v5 = vld [vmem:[%s1638_s4 + $0x14] ss:$8 sps:$4 sm:$0xff] (!%p350_p2)   ;;  %719 = vmatprep.subr.bf16.mxu1 (!%p350_p2), %v1236_v3  ;;  %v1241_v6 = vld [vmem:[%s1638_s4 + $0x10] ss:$8 sps:$4 sm:$0xff] (!%p350_p2)   ;;  %v1242_v7 = vld [vmem:[%s1638_s4 + $0x24] ss:$8 sps:$4 sm:$0xff] (!%p350_p2)  }
   0x8   : > { %720 = vmatpush1.bf16.msra.mxu1 (!%p350_p2), %v1238_v4  ;;  %vm443_vm0 = vcmask (!%p350_p2), 130048   ;;  %v1244_v11 = vld [vmem:[%s1638_s4 + $0x20] ss:$8 sps:$4 sm:$0xff] (!%p350_p2)   ;;  %v1245_v12 = vld [vmem:[%s1638_s4 + $0x34] ss:$8 sps:$4 sm:$0xff] (!%p350_p2)   ;;  %v1545_v48 = vshrl.u32 (!%p350_p2), %v423_v47, 7 }
   0x9   : > { %721 = vmatprep.subr.bf16.mxu1 (!%p350_p2), %v1239_v5  ;;  %v1247_v15 = vld [vmem:[%s1638_s4 + $0x30] ss:$8 sps:$4 sm:$0xff] (!%p350_p2)   ;;  %v1248_v17 = vld [vmem:[%s1638_s4 + $0x44] ss:$8 sps:$4 sm:$0xff] (!%p350_p2)   ;;  %v1250_v18 = vld [vmem:[%s1638_s4 + $0x40] ss:$8 sps:$4 sm:$0xff] (!%p350_p2)  }
   0xa   : > { %v1251_v19 = vld [vmem:[%s1638_s4 + $0x54] ss:$8 sps:$4 sm:$0xff] (!%p350_p2)   ;;  %v1253_v20 = vld [vmem:[%s1638_s4 + $0x50] ss:$8 sps:$4 sm:$0xff] (!%p350_p2)   ;;  %v1254_v21 = vld [vmem:[%s1638_s4 + $0x64] ss:$8 sps:$4 sm:$0xff] (!%p350_p2)  }
   0xb   : > { %v1256_v22 = vld [vmem:[%s1638_s4 + $0x60] ss:$8 sps:$4 sm:$0xff] (!%p350_p2)   ;;  %v1257_v23 = vld [vmem:[%s1638_s4 + $0x74] ss:$8 sps:$4 sm:$0xff] (!%p350_p2)   ;;  %v1259_v24 = vld [vmem:[%s1638_s4 + $0x70] ss:$8 sps:$4 sm:$0xff] (!%p350_p2)  }
   0xc   : > { %722 = vmatpush1.bf16.msra.mxu1 (!%p350_p2), %v1241_v6  ;;  %v1260_v25 = vld [vmem:[%s1638_s4 + $0x84] ss:$8 sps:$4 sm:$0xff] (!%p350_p2)   ;;  %v1262_v26 = vld [vmem:[%s1638_s4 + $0x80] ss:$8 sps:$4 sm:$0xff] (!%p350_p2)   ;;  %v1263_v27 = vld [vmem:[%s1638_s4 + $0x94] ss:$8 sps:$4 sm:$0xff] (!%p350_p2)  }
   0xd   : > { %s1647_s21 = smov (!%p395_p3, %s1128_s21), 7  ;;  %723 = vmatprep.subr.bf16.mxu1 %v1242_v7  ;;  %v1265_v28 = vld [vmem:[%s1638_s4 + $0x90] ss:$8 sps:$4 sm:$0xff]   ;;  %v1266_v29 = vld [vmem:[%s1638_s4 + $0xa4] ss:$8 sps:$4 sm:$0xff]   ;;  %v425_v49 = vsub.s32 0, %v1545_v48 }
   0xe   : > { %s1432_s30 = sshll.u32 %s1647_s21, 3  ;;  %v1268_v30 = vld [vmem:[%s1638_s4 + $0xa0] ss:$8 sps:$4 sm:$0xff]   ;;  %v1269_v31 = vld [vmem:[%s1638_s4 + $0xb4] ss:$8 sps:$4 sm:$0xff]   ;;  %v429_v51 = vsub.s32 1, %v1545_v48 }
   0xf   : > { %s398_s16 = scalar_lea.vmem %s1634_s0, %s1432_s30  ;;  %v1271_v32 = vld [vmem:[%s1638_s4 + $0xb0] ss:$8 sps:$4 sm:$0xff]   ;;  %v1272_v33 = vld [vmem:[%s1638_s4 + $0xc4] ss:$8 sps:$4 sm:$0xff]   ;;  %v1274_v34 = vld [vmem:[%s1638_s4 + $0xc0] ss:$8 sps:$4 sm:$0xff]   ;;  %s404_s29 = scalar_lea.vmem %s1635_s1, %s1432_s30 }
  0x10   : > { %v413_v8 = vld [vmem:[%s398_s16] sm:$0xff]  ;;  %v414_v9 = vld [vmem:[%s398_s16 + $0x8] sm:$0xff]  ;;  %v415_v13 = vld [vmem:[%s398_s16 + $0x10] sm:$0xff]  ;;  %724 = vmatpush1.bf16.msra.mxu1 %v1244_v11  ;;  %vm1033_vm1 = vcmask 64512   ;;  %vm1050_vm2 = vcmask 72768  }
  0x11   : > { %v417_v10 = vpack.c.bf16 %v414_v9, %v413_v8  ;;  %v416_v14 = vld [vmem:[%s398_s16 + $0x18] sm:$0xff]  ;;  %725 = vmatprep.subr.bf16.mxu1 %v1245_v12  ;;  %v1278_v37 = vld [vmem:[%s1638_s4 + $0xe4] ss:$8 sps:$4 sm:$0xff]   ;;  %v1280_v38 = vld [vmem:[%s1638_s4 + $0xe0] ss:$8 sps:$4 sm:$0xff]   ;;  %s1607_s16 = scalar_lea.vmem %s1645_s11, %s1432_s30 }
  0x12   : > { %v418_v16 = vpack.c.bf16 %v416_v14, %v415_v13  ;;  %v1275_v35 = vld [vmem:[%s1638_s4 + $0xd4] ss:$8 sps:$4 sm:$0xff]   ;;  %v1277_v36 = vld [vmem:[%s1638_s4 + $0xd0] ss:$8 sps:$4 sm:$0xff]   ;;  %v1284_v41 = vld [vmem:[%s1640_s6 + $0x40] sm:$0xff]  }
  0x13   : > { %1136 = vmatmul.mubr.msk.bf16.vlgmr.msra.gmra.mrb[0].mxu0 %vm443_vm0, %v417_v10  ;;  %v1281_v39 = vld [vmem:[%s1638_s4 + $0xf4] ss:$8 sps:$4 sm:$0xff]   ;;  %v1283_v40 = vld [vmem:[%s1638_s4 + $0xf0] ss:$8 sps:$4 sm:$0xff]   ;;  %v1285_v42 = vld [vmem:[%s1640_s6] sm:$0xff]   ;;  %1196 = vmatprep.subr.bf16.mxu0 %v1284_v41 }
  0x14   : > { %492 = vmatprep.mubr.bf16.mxu0 %v1348_v2  ;;  %726 = vmatpush1.bf16.msra.mxu1 %v1247_v15  ;;  %v1286_v43 = vld [vmem:[%s1640_s6 + $0x48] sm:$0xff]   ;;  %v1288_v45 = vld [vmem:[%s1640_s6 + $0x50] sm:$0xff]   ;;  %v421_v50 = vld [vmem:[%s1637_s3] sm:$0x3] }
  0x15   : > { %727 = vmatprep.subr.bf16.mxu1 %v1248_v17  ;;  %1197 = vmatpush3.bf16.msra.mxu0 %v1285_v42  ;;  %v1287_v44 = vld [vmem:[%s1640_s6 + $0x8] sm:$0xff]   ;;  %v1289_v46 = vld [vmem:[%s1640_s6 + $0x10] sm:$0xff]   ;;  %v426_v52 = vrot.slane %v421_v50, %v425_v49  ;;  %v430_v53 = vrot.slane %v421_v50, %v429_v51 }
  0x16   : > { %1198 = vmatprep.subr.bf16.mxu0 %v1286_v43 }
  0x18   : > { %728 = vmatpush1.bf16.msra.mxu1 %v1250_v18  ;;  %v1290_v18 = vld [vmem:[%s1640_s6 + $0x58] sm:$0xff]  }
  0x19   : > { %729 = vmatprep.subr.bf16.mxu1 %v1251_v19  ;;  %1199 = vmatpush3.bf16.msra.mxu0 %v1287_v44  ;;  %v1291_v19 = vld [vmem:[%s1640_s6 + $0x18] sm:$0xff]  }
  0x1a   : > { %1200 = vmatprep.subr.bf16.mxu0 %v1288_v45 }
  0x1b   : > { %1137 = vmatmul.mubr.msk.bf16.gmra.mrb[4].mxu0 %vm443_vm0, %v418_v16 }
  0x1c   : > { %730 = vmatpush1.bf16.msra.mxu1 %v1253_v20  ;;  %v1292_v20 = vld [vmem:[%s1640_s6 + $0x60] sm:$0xff]  }
  0x1d   : > { %731 = vmatprep.subr.bf16.mxu1 %v1254_v21  ;;  %1201 = vmatpush3.bf16.msra.mxu0 %v1289_v46  ;;  %v1293_v21 = vld [vmem:[%s1640_s6 + $0x20] sm:$0xff]  }
  0x1e   : > { %1202 = vmatprep.subr.bf16.mxu0 %v1290_v18 }
  0x20   : > { %732 = vmatpush1.bf16.msra.mxu1 %v1256_v22  ;;  %v1294_v22 = vld [vmem:[%s1640_s6 + $0x68] sm:$0xff]  }
  0x21   : > { %733 = vmatprep.subr.bf16.mxu1 %v1257_v23  ;;  %1203 = vmatpush3.bf16.msra.mxu0 %v1291_v19  ;;  %v1295_v23 = vld [vmem:[%s1640_s6 + $0x28] sm:$0xff]  }
  0x22   : > { %1204 = vmatprep.subr.bf16.mxu0 %v1292_v20  ;;  %v975_v20 = vld [vmem:[%s404_s29 + $0x10] sm:$0xff] }
  0x24   : > { %734 = vmatpush1.bf16.msra.mxu1 %v1259_v24  ;;  %v1296_v24 = vld [vmem:[%s1640_s6 + $0x70] sm:$0xff]  }
  0x25   : > { %735 = vmatprep.subr.bf16.mxu1 %v1260_v25  ;;  %1205 = vmatpush3.bf16.msra.mxu0 %v1293_v21  ;;  %v1297_v25 = vld [vmem:[%s1640_s6 + $0x30] sm:$0xff]  }
  0x26   : > { %1206 = vmatprep.subr.bf16.mxu0 %v1294_v22 }
  0x28   : > { %736 = vmatpush1.bf16.msra.mxu1 %v1262_v26  ;;  %v1298_v26 = vld [vmem:[%s1640_s6 + $0x78] sm:$0xff]  }
  0x29   : > { %737 = vmatprep.subr.bf16.mxu1 %v1263_v27  ;;  %1207 = vmatpush3.bf16.msra.mxu0 %v1295_v23  ;;  %v1299_v27 = vld [vmem:[%s1640_s6 + $0x38] sm:$0xff]   ;;  %v1192_v23 = vld [vmem:[%s1643_s9] ss:$0 sm:$0xff] }
  0x2a   : > { %1208 = vmatprep.subr.bf16.mxu0 %v1296_v24  ;;  %v976_v24 = vld [vmem:[%s404_s29 + $0x18] sm:$0xff] }
  0x2c   : > { %738 = vmatpush1.bf16.msra.mxu1 %v1265_v28  ;;  %v547_v28 = vld [vmem:[%s1639_s5] sm:$0x3] }
  0x2d   : > { %739 = vmatprep.subr.bf16.mxu1 %v1266_v29  ;;  %1209 = vmatpush3.bf16.msra.mxu0 %v1297_v25  ;;  %v552_v29 = vrot.slane %v547_v28, %v425_v49 }
  0x2e   : > { %1210 = vmatprep.subr.bf16.mxu0 %v1298_v26 }
  0x30   : > { %740 = vmatpush1.bf16.msra.mxu1 %v1268_v30  ;;  %v556_v30 = vrot.slane %v547_v28, %v429_v51 }
  0x31   : > { %741 = vmatprep.subr.bf16.mxu1 %v1269_v31  ;;  %1211 = vmatpush3.bf16.msra.mxu0 %v1299_v27 }
  0x34   : > { %742 = vmatpush1.bf16.msra.mxu1 %v1271_v32 }
  0x35   : > { %743 = vmatprep.subr.bf16.mxu1 %v1272_v33 }
  0x38   : > { %744 = vmatpush1.bf16.msra.mxu1 %v1274_v34 }
  0x39   : > { %745 = vmatprep.subr.bf16.mxu1 %v1275_v35 }
  0x3c   : > { %746 = vmatpush1.bf16.msra.mxu1 %v1277_v36 }
  0x3d   : > { %747 = vmatprep.subr.bf16.mxu1 %v1278_v37 }
  0x40   : > { %748 = vmatpush1.bf16.msra.mxu1 %v1280_v38 }
  0x41   : > { %749 = vmatprep.subr.bf16.mxu1 %v1281_v39 }
  0x44   : > { %750 = vmatpush1.bf16.msra.mxu1 %v1283_v40 }
  0xe6   : > { %v484_v54 = vpop.f32.mrb[0].mxu0 }
  0xe7   : > { %v485_v55 = vadd.f32 %v484_v54, %v426_v52  ;;  %v486_v56 = vpop.f32.mrb[1].mxu0 }
  0xe8   : > { %v487_v57 = vadd.f32 %v486_v56, %v430_v53  ;;  %v488_v58 = vpop.f32.mrb[2].mxu0 }
  0xe9   : > { %1300 = vtanh.f32 %v485_v55  ;;  %v489_v59 = vadd.f32 %v488_v58, %v426_v52  ;;  %v490_v60 = vpop.f32.mrb[3].mxu0 }
  0xea   : > { %1302 = vtanh.f32 %v487_v57  ;;  %v491_v61 = vadd.f32 %v490_v60, %v430_v53  ;;  %v1170_v60 = vld [vmem:[%s1641_s7] ss:$0 sm:$0xff] }
  0xeb   : > { %1304 = vtanh.f32 %v489_v59 }
  0xec   : > { %1306 = vtanh.f32 %v491_v61 }
  0xee   : > { %v494_v62 = vpop.f32.mrb[4].mxu0 }
  0xef   : > { %v495_v63 = vadd.f32 %v494_v62, %v426_v52  ;;  %v496_v0 = vpop.f32.mrb[5].mxu0 }
  0xf0   : > { %v497_v1 = vadd.f32 %v496_v0, %v430_v53  ;;  %v498_v2 = vpop.f32.mrb[6].mxu0 }
  0xf1   : > { %1308 = vtanh.f32 %v495_v63  ;;  %v499_v3 = vadd.f32 %v498_v2, %v426_v52  ;;  %v500_v4 = vpop.f32.mrb[7].mxu0 }
  0xf2   : > { %1310 = vtanh.f32 %v497_v1  ;;  %v501_v5 = vadd.f32 %v500_v4, %v430_v53 }
  0xf3   : > { %v1301_v6 = vpop.eup %1300  ;;  %1312 = vtanh.f32 %v499_v3 }
  0xf4   : > { %v1303_v7 = vpop.eup %1302  ;;  %1314 = vtanh.f32 %v501_v5 }
  0xf5   : > { %v1305_v8 = vpop.eup %1304 }
  0xf6   : > { %v1307_v9 = vpop.eup %1306  ;;  %v511_v10 = vpack.c.bf16 %v1305_v8, %v1301_v6  ;;  %v1187_v8 = vld [vmem:[%s1642_s8] ss:$0 sm:$0xff] }
  0xf7   : > { %v512_v11 = vpack.c.bf16 %v1307_v9, %v1303_v7  ;;  %v973_v9 = vld [vmem:[%s404_s29] sm:$0xff]  ;;  %v985_v27 = vmul.f32 %v1187_v8, %v975_v20 }
  0xf9   : > { %751 = vmatprep.mubr.bf16.mxu1 %v512_v11 }
  0xfa   : > { %752 = vmatmul.mubr.bf16.vlgmr.msra.gmra.mrb[0].mxu1 %v511_v10 }
  0xfb   : > { %v1309_v12 = vpop.eup %1308 }
  0xfc   : > { %v1311_v13 = vpop.eup %1310 }
  0xfd   : > { %v1313_v14 = vpop.eup %1312 }
  0xfe   : > { %v1315_v15 = vpop.eup %1314  ;;  %v513_v16 = vpack.c.bf16 %v1313_v14, %v1309_v12  ;;  %v983_v14 = vmul.f32 %v1187_v8, %v973_v9 }
  0xff   : > { %v514_v17 = vpack.c.bf16 %v1315_v15, %v1311_v13  ;;  %v974_v13 = vld [vmem:[%s404_s29 + $0x8] sm:$0xff] }
 0x101   : > { %761 = vmatprep.mubr.bf16.mxu1 %v514_v17 }
 0x102   : > { %762 = vmatmul.mubr.bf16.gmra.mrb[4].mxu1 %v513_v16  ;;  %v984_v16 = vmul.f32 %v1187_v8, %v974_v13 }
 0x1cd   : > { %v753_v31 = vpop.f32.mrb[0].mxu1 }
 0x1ce   : > { %v754_v32 = vadd.f32 %v753_v31, %v552_v29  ;;  %v755_v33 = vpop.f32.mrb[1].mxu1 }
 0x1cf   : > { %v756_v34 = vadd.f32 %v755_v33, %v556_v30  ;;  %v757_v35 = vpop.f32.mrb[2].mxu1 }
 0x1d0   : > { %1316 = vtanh.f32 %v754_v32  ;;  %v758_v36 = vadd.f32 %v757_v35, %v552_v29  ;;  %v759_v37 = vpop.f32.mrb[3].mxu1 }
 0x1d1   : > { %1318 = vtanh.f32 %v756_v34  ;;  %v760_v38 = vadd.f32 %v759_v37, %v556_v30 }
 0x1d2   : > { %1320 = vtanh.f32 %v758_v36  ;;  %v1193_v36 = vld [vmem:[%s1644_s10] ss:$0 sm:$0xff] }
 0x1d3   : > { %1322 = vtanh.f32 %v760_v38 }
 0x1d5   : > { %v763_v39 = vpop.f32.mrb[4].mxu1 }
 0x1d6   : > { %v764_v40 = vadd.f32 %v763_v39, %v552_v29  ;;  %v765_v41 = vpop.f32.mrb[5].mxu1 }
 0x1d7   : > { %v766_v42 = vadd.f32 %v765_v41, %v556_v30  ;;  %v767_v43 = vpop.f32.mrb[6].mxu1 }
 0x1d8   : > { %1324 = vtanh.f32 %v764_v40  ;;  %v768_v44 = vadd.f32 %v767_v43, %v552_v29  ;;  %v769_v45 = vpop.f32.mrb[7].mxu1 }
 0x1d9   : > { %1326 = vtanh.f32 %v766_v42  ;;  %v770_v46 = vadd.f32 %v769_v45, %v556_v30  ;;  %v986_v30 = vmul.f32 %v1187_v8, %v976_v24 }
 0x1da   : > { %v1317_v47 = vpop.eup %1316  ;;  %1328 = vtanh.f32 %v768_v44 }
 0x1db   : > { %v1319_v48 = vpop.eup %1318  ;;  %1330 = vtanh.f32 %v770_v46 }
 0x1dc   : > { %v1321_v49 = vpop.eup %1320 }
 0x1dd   : > { %v1323_v50 = vpop.eup %1322  ;;  %v780_v51 = vpack.c.bf16 %v1321_v49, %v1317_v47 }
 0x1de   : > { %v781_v52 = vpack.c.bf16 %v1323_v50, %v1319_v48 }
 0x1e0   : > { %951 = vmatprep.mubr.bf16.mxu0 %v781_v52 }
 0x1e1   : > { %952 = vmatmul.mubr.bf16.vlgmr.msra.gmra.mrb[8].mxu0 %v780_v51 }
 0x1e2   : > { %v1325_v53 = vpop.eup %1324 }
 0x1e3   : > { %v1327_v54 = vpop.eup %1326 }
 0x1e4   : > { %v1329_v55 = vpop.eup %1328 }
 0x1e5   : > { %v1331_v56 = vpop.eup %1330  ;;  %v782_v57 = vpack.c.bf16 %v1329_v55, %v1325_v53 }
 0x1e6   : > { %v783_v58 = vpack.c.bf16 %v1331_v56, %v1327_v54 }
 0x1e8   : > { %959 = vmatprep.mubr.bf16.mxu0 %v783_v58 }
 0x1e9   : > { %960 = vmatmul.mubr.bf16.gmra.mrb[12].mxu0 %v782_v57 }
 0x2b4   : > { %v1212_v59 = vpop.f32.mrb[8].mxu0 }
 0x2b5   : > { %v1213_v61 = vpop.f32.mrb[9].mxu0 }
 0x2b6   : > { %v1214_v62 = vadd.f32 %v1213_v61, %v1212_v59  ;;  %v1215_v63 = vpop.f32.mrb[10].mxu0 }
 0x2b7   : > { %v1216_v0 = vpop.f32.mrb[11].mxu0 }
 0x2b8   : > { %v954_v1 = vadd.f32 %v1214_v62, %v1170_v60  ;;  %v1217_v2 = vadd.f32 %v1216_v0, %v1215_v63 }
 0x2ba   : > { %1332 = vtanh.f32 %v954_v1  ;;  %v957_v3 = vadd.f32 %v1217_v2, %v1170_v60 }
 0x2bc   : > { %1334 = vtanh.f32 %v957_v3  ;;  %v1218_v4 = vpop.f32.mrb[12].mxu0 }
 0x2bd   : > { %v1219_v5 = vpop.f32.mrb[13].mxu0 }
 0x2be   : > { %v1220_v6 = vadd.f32 %v1219_v5, %v1218_v4  ;;  %v1221_v7 = vpop.f32.mrb[14].mxu0 }
 0x2bf   : > { %v1222_v10 = vpop.f32.mrb[15].mxu0 }
 0x2c0   : > { %v962_v11 = vadd.f32 %v1220_v6, %v1170_v60  ;;  %v1223_v12 = vadd.f32 %v1222_v10, %v1221_v7 }
 0x2c2   : > { %1336 = vtanh.f32 %v962_v11  ;;  %v965_v15 = vadd.f32 %v1223_v12, %v1170_v60 }
 0x2c4   : > { %v1333_v17 = vpop.eup %1332  ;;  %1338 = vtanh.f32 %v965_v15 }
 0x2c5   : > { %v987_v18 = vadd.f32 %v1333_v17, %v983_v14 }
 0x2c6   : > { %v1335_v19 = vpop.eup %1334 }
 0x2c7   : > { %v1188_v21 = vclamps-f32 %v987_v18, 1.0  ;;  %v988_v22 = vadd.f32 %v1335_v19, %v984_v16 }
 0x2c9   : > { %v999_v25 = vsub.f32 %v1188_v21, %v1333_v17  ;;  %1034 = vst.msk [vmem:[%s1607_s16] sm:$0xff] %vm1033_vm1, %v1188_v21  ;;  %v1189_v26 = vclamps-f32 %v988_v22, 1.0 }
 0x2cb   : > { %v1010_v28 = vmul.f32 %v1192_v23, %v999_v25  ;;  %v1000_v29 = vsub.f32 %v1189_v26, %v1335_v19  ;;  %1035 = vst.msk [vmem:[%s1607_s16 + $0x8] sm:$0xff] %vm1033_vm1, %v1189_v26 }
 0x2cc   : > { %v1337_v31 = vpop.eup %1336 }
 0x2cd   : > { %v1015_v32 = vmul.f32 0.5, %v1010_v28  ;;  %v1011_v33 = vmul.f32 %v1192_v23, %v1000_v29  ;;  %v989_v34 = vadd.f32 %v1337_v31, %v985_v27 }
 0x2ce   : > { %v1339_v35 = vpop.eup %1338 }
 0x2cf   : > { %v1019_v37 = vmul.f32 %v1015_v32, %v1010_v28  ;;  %v1016_v38 = vmul.f32 0.5, %v1011_v33  ;;  %v1190_v39 = vclamps-f32 %v989_v34, 1.0  ;;  %v990_v40 = vadd.f32 %v1339_v35, %v986_v30 }
 0x2d1   : > { %v1029_v41 = vsub.f32 %v1193_v36, %v1019_v37  ;;  %v1020_v42 = vmul.f32 %v1016_v38, %v1011_v33  ;;  %v1001_v43 = vsub.f32 %v1190_v39, %v1337_v31  ;;  %1036 = vst.msk [vmem:[%s1607_s16 + $0x10] sm:$0xff] %vm1033_vm1, %v1190_v39  ;;  %v1191_v44 = vclamps-f32 %v990_v40, 1.0 }
 0x2d3   : > { %v1038_v45 = vsel %vm1033_vm1, %v1029_v41, 0.0  ;;  %v1030_v46 = vsub.f32 %v1193_v36, %v1020_v42  ;;  %v1012_v47 = vmul.f32 %v1192_v23, %v1001_v43  ;;  %v1002_v48 = vsub.f32 %v1191_v44, %v1339_v35  ;;  %1037 = vst.msk [vmem:[%s1607_s16 + $0x18] sm:$0xff] %vm1033_vm1, %v1191_v44 }
 0x2d4   : > { %1039 = vadd.xlane.f32.xlu0 %v1038_v45 }
 0x2d5   : > { %v1017_v49 = vmul.f32 0.5, %v1012_v47  ;;  %v1013_v50 = vmul.f32 %v1192_v23, %v1002_v48  ;;  %v1041_v51 = vsel %vm1033_vm1, %v1030_v46, 0.0 }
 0x2d7   : > { %v1021_v52 = vmul.f32 %v1017_v49, %v1012_v47  ;;  %v1018_v53 = vmul.f32 0.5, %v1013_v50 }
 0x2d8   : > { %1042 = vadd.xlane.f32.xlu0 %v1041_v51 }
 0x2d9   : > { %v1031_v54 = vsub.f32 %v1193_v36, %v1021_v52  ;;  %v1022_v55 = vmul.f32 %v1018_v53, %v1013_v50 }
 0x2db   : > { %v1044_v56 = vsel %vm1033_vm1, %v1031_v54, 0.0  ;;  %v1032_v57 = vsub.f32 %v1193_v36, %v1022_v55 }
 0x2dc   : > { %1045 = vadd.xlane.f32.xlu1 %v1044_v56 }
 0x2dd   : > { %v1047_v58 = vsel %vm1033_vm1, %v1032_v57, 0.0 }
 0x2e0   : > { %1048 = vadd.xlane.f32.xlu1 %v1047_v58 }
 0x361   : > { %v1040_v59 = vpop.xlane.xlu0 %1039 }
 0x362   : > { %1051 = vst.msk [vmem:[%s1607_s16] sm:$0xff] %vm1050_vm2, %v1040_v59 }
 0x365   : > { %v1043_v60 = vpop.xlane.xlu0 %1042 }
 0x366   : > { %1052 = vst.msk [vmem:[%s1607_s16 + $0x8] sm:$0xff] %vm1050_vm2, %v1043_v60 }
 0x369   : > { %v1046_v61 = vpop.xlane.xlu1 %1045 }
 0x36a   : > { %1053 = vst.msk [vmem:[%s1607_s16 + $0x10] sm:$0xff] %vm1050_vm2, %v1046_v61 }
 0x36d   : > { %v1049_v62 = vpop.xlane.xlu1 %1048 }
 0x36e   : > { %1054 = vst.msk [vmem:[%s1607_s16 + $0x18] sm:$0xff] %vm1050_vm2, %v1049_v62 }
 0x36f PF: > { %s21_s17 = sadd.s32 1, %s1346_s17  }
 0x370   : > { %p18_p4 = scmp.ge.s32.totalorder %s21_s17, 4  }
 0x372   :  { %20 = sbr.rel (!%p18_p4) target bundleno = 1 (0x1), region = 97 }

</bundles_post_ra>
